<compile_context>
chip_gen: v5e
topology: v5e:2x2
jax: 0.10.0
libtpu: 0.0.40
codegen_flags: <defaults>
</compile_context>

<pallas_src>
import functools

import jax
import jax.numpy as jnp
from jax.experimental import pallas as pl
from jax.experimental.pallas import tpu as pltpu


# ----------------------------- kernel bodies -------------------------------- #

def _kernel_4d(x_ref, o_ref, *, To, pf, pt, f_first):
    # x_ref: (pf, T, M)   -- the pf frequency rows of one (batch, of) slab
    # o_ref: (To, M, P)   -- the To patches this slab produces, P = pf*pt
    Tc = To * pt
    for kf in range(pf):
        s = x_ref[kf]                                   # (T, M)
        if s.shape[0] != Tc:                            # drop unfold remainder
            s = s[:Tc]
        s = s.reshape(To, pt, s.shape[-1])              # (To, pt, M)
        if not f_first:
            # p = kf*pt + kt -> one contiguous pt-wide lane slice per kf row.
            o_ref[:, :, kf * pt:(kf + 1) * pt] = jnp.swapaxes(s, 1, 2)
        else:
            # p = kt*pf + kf -> lane positions are pf-strided; store columns.
            for kt in range(pt):
                o_ref[:, :, kt * pf + kf] = s[:, kt, :]


def _kernel_5d(x_ref, o_ref, *, To, pf, pt, f_first):
    # x_ref: (pf, T, R*M)   o_ref: (To, P, R*M)
    # Channels stay minormost, so this is a pure sublane re-grouping.
    Tc = To * pt
    for kf in range(pf):
        s = x_ref[kf]                                   # (T, R*M)
        if s.shape[0] != Tc:
            s = s[:Tc]
        s = s.reshape(To, pt, s.shape[-1])              # (To, pt, R*M)
        if not f_first:
            o_ref[:, kf * pt:(kf + 1) * pt, :] = s
        else:
            for kt in range(pt):
                o_ref[:, kt * pf + kf, :] = s[:, kt, :]


# ----------------------------- wrapper --------------------------------------- #

def patch_split(x, patch_shape, f_first=False):
    """Pallas TPU implementation of PatchSplit.forward (no parameters)."""
    pf, pt = int(patch_shape[0]), int(patch_shape[1])

    if x.ndim == 4:
        B, F, T, M = x.shape
        Mp = M
        x_in = x
        body = _kernel_4d
    elif x.ndim == 5:
        B, F, T, R, M = x.shape
        Mp = R * M
        x_in = x.reshape(B, F, T, Mp)   # fold (nreim, nmic) -> one channel dim
        body = _kernel_5d
    else:
        raise ValueError("PatchSplit expects a 4D or 5D input")

    Fo, To = F // pf, T // pt
    L, P = Fo * To, pf * pt

    kernel = functools.partial(body, To=To, pf=pf, pt=pt, f_first=f_first)

    grid = (B, Fo)
    # Input slab: pf frequency rows, full time & channel extent (last two dims
    # of the block equal the full array dims -> layout-friendly DMA).
    in_spec = pl.BlockSpec((None, pf, T, Mp), lambda b, f: (b, f, 0, 0))

    if x.ndim == 4:
        if not f_first:
            out_shape = jax.ShapeDtypeStruct((B, L, M, P), x.dtype)
            out_spec = pl.BlockSpec((None, To, M, P), lambda b, f: (b, f, 0, 0))
            post = lambda y: y
        else:
            # L is ot-major for f_first; stage as (B, To, Fo, M, P) so each grid
            # step writes one contiguous block, then merge leading dims (free).
            out_shape = jax.ShapeDtypeStruct((B, To, Fo, M, P), x.dtype)
            out_spec = pl.BlockSpec((None, To, None, M, P),
                                    lambda b, f: (b, 0, f, 0, 0))
            post = lambda y: y.reshape(B, L, M, P)
    else:
        if not f_first:
            out_shape = jax.ShapeDtypeStruct((B, L, P, Mp), x.dtype)
            out_spec = pl.BlockSpec((None, To, P, Mp), lambda b, f: (b, f, 0, 0))
        else:
            out_shape = jax.ShapeDtypeStruct((B, To, Fo, P, Mp), x.dtype)
            out_spec = pl.BlockSpec((None, To, None, P, Mp),
                                    lambda b, f: (b, 0, f, 0, 0))
        post = lambda y: y.reshape(B, L, P, R, M)

    y = pl.pallas_call(
        kernel,
        grid=grid,
        in_specs=[in_spec],
        out_specs=out_spec,
        out_shape=out_shape,
        compiler_params=pltpu.CompilerParams(
            dimension_semantics=("parallel", "parallel")),
    )(x_in)
    return post(y)


# --------------------- pure-JAX reference (PyTorch semantics) ---------------- #

def patch_split_ref(x, patch_shape, f_first=False):
    pf, pt = int(patch_shape[0]), int(patch_shape[1])
    if x.ndim == 4:
        B, F, T, M = x.shape
        Fo, To = F // pf, T // pt
        x6 = x[:, :Fo * pf, :To * pt, :].reshape(B, Fo, pf, To, pt, M)
        if not f_first:
            out = x6.transpose(0, 1, 3, 5, 2, 4)   # (B, of, ot, m, kf, kt)
        else:
            out = x6.transpose(0, 3, 1, 5, 4, 2)   # (B, ot, of, m, kt, kf)
        return out.reshape(B, Fo * To, M, pf * pt)
    else:
        B, F, T, R, M = x.shape
        Fo, To = F // pf, T // pt
        x7 = x[:, :Fo * pf, :To * pt].reshape(B, Fo, pf, To, pt, R, M)
        if not f_first:
            out = x7.transpose(0, 1, 3, 2, 4, 5, 6)  # (B, of, ot, kf, kt, r, m)
        else:
            out = x7.transpose(0, 3, 1, 4, 2, 5, 6)  # (B, ot, of, kt, kf, r, m)
        return out.reshape(B, Fo * To, pf * pt, R, M)


# ----------------------------- demo / test ----------------------------------- #

if __name__ == "__main__":
    key = jax.random.PRNGKey(0)
    k1, k2, k3, k4 = jax.random.split(key, 4)

    cases = [
        # 4D: (batch, nf, nt, nmic), patch_shape
        (jax.random.normal(k1, (2, 8, 16, 4), dtype=jnp.float32), (4, 4)),
        (jax.random.normal(k2, (2, 16, 32, 8), dtype=jnp.float32), (4, 8)),
        # 5D: (batch, nf, nt, nreim, nmic), patch_shape
        (jax.random.normal(k3, (2, 4, 8, 2, 4), dtype=jnp.float32), (2, 4)),
        (jax.random.normal(k4, (2, 8, 32, 2, 8), dtype=jnp.float32), (4, 4)),
    ]

    ok = True
    for x, ps in cases:
        for ff in (False, True):
            out = jax.block_until_ready(patch_split(x, ps, f_first=ff))
            ref = patch_split_ref(x, ps, f_first=ff)
            if out.shape != ref.shape or not bool(jnp.array_equal(out, ref)):
                ok = False
                print("MISMATCH", x.shape, ps, ff, out.shape, ref.shape)

    if ok:
        print("KERNEL_OK")
</pallas_src>

<mosaic_0001>
module attributes {stable_mosaic.version = 11 : i64} {
  func.func @_kernel_4d(%arg0: i32, %arg1: i32, %arg2: memref<1x4x16x4xf32, #tpu.memory_space<vmem>>, %arg3: memref<1x4x4x16xf32, #tpu.memory_space<vmem>>) attributes {dimension_semantics = [#tpu.dimension_semantics<parallel>, #tpu.dimension_semantics<parallel>], iteration_bounds = array<i64: 2, 2>, scalar_prefetch = 0 : i64, scratch_operands = 0 : i64, tpu.core_type = #tpu.core_type<tc>, window_params = [{transform_indices = @transform_0, window_bounds = array<i64: 1, 4, 16, 4>}, {transform_indices = @transform_1, window_bounds = array<i64: 1, 4, 4, 16>}]} {
    %c0 = arith.constant 0 : index
    %c0_0 = arith.constant 0 : index
    %c0_1 = arith.constant 0 : index
    %c0_2 = arith.constant 0 : index
    %0 = vector.load %arg2[%c0, %c0_0, %c0_1, %c0_2] : memref<1x4x16x4xf32, #tpu.memory_space<vmem>>, vector<1x1x16x4xf32>
    %1 = vector.shape_cast %0 : vector<1x1x16x4xf32> to vector<16x4xf32>
    %2 = vector.shape_cast %1 : vector<16x4xf32> to vector<4x4x4xf32>
    %3 = tpu.transpose %2, [0, 2, 1] : vector<4x4x4xf32> -> vector<4x4x4xf32>
    %c0_3 = arith.constant 0 : index
    %c0_4 = arith.constant 0 : index
    %c0_5 = arith.constant 0 : index
    %c0_6 = arith.constant 0 : index
    %4 = vector.load %arg3[%c0_3, %c0_4, %c0_5, %c0_6] : memref<1x4x4x16xf32, #tpu.memory_space<vmem>>, vector<1x4x4x4xf32>
    %5 = vector.shape_cast %4 : vector<1x4x4x4xf32> to vector<4x4x4xf32>
    %6 = vector.shape_cast %3 : vector<4x4x4xf32> to vector<1x4x4x4xf32>
    tpu.vector_store %arg3[%c0_3, %c0_4, %c0_5, %c0_6], %6 {strides = array<i32>} : memref<1x4x4x16xf32, #tpu.memory_space<vmem>>, vector<1x4x4x4xf32>,
    %c0_7 = arith.constant 0 : index
    %c1 = arith.constant 1 : index
    %c0_8 = arith.constant 0 : index
    %c0_9 = arith.constant 0 : index
    %7 = vector.load %arg2[%c0_7, %c1, %c0_8, %c0_9] : memref<1x4x16x4xf32, #tpu.memory_space<vmem>>, vector<1x1x16x4xf32>
    %8 = vector.shape_cast %7 : vector<1x1x16x4xf32> to vector<16x4xf32>
    %9 = vector.shape_cast %8 : vector<16x4xf32> to vector<4x4x4xf32>
    %10 = tpu.transpose %9, [0, 2, 1] : vector<4x4x4xf32> -> vector<4x4x4xf32>
    %c0_10 = arith.constant 0 : index
    %c0_11 = arith.constant 0 : index
    %c0_12 = arith.constant 0 : index
    %c4 = arith.constant 4 : index
    %11 = vector.load %arg3[%c0_10, %c0_11, %c0_12, %c4] : memref<1x4x4x16xf32, #tpu.memory_space<vmem>>, vector<1x4x4x4xf32>
    %12 = vector.shape_cast %11 : vector<1x4x4x4xf32> to vector<4x4x4xf32>
    %13 = vector.shape_cast %10 : vector<4x4x4xf32> to vector<1x4x4x4xf32>
    tpu.vector_store %arg3[%c0_10, %c0_11, %c0_12, %c4], %13 {strides = array<i32>} : memref<1x4x4x16xf32, #tpu.memory_space<vmem>>, vector<1x4x4x4xf32>,
    %c0_13 = arith.constant 0 : index
    %c2 = arith.constant 2 : index
    %c0_14 = arith.constant 0 : index
    %c0_15 = arith.constant 0 : index
    %14 = vector.load %arg2[%c0_13, %c2, %c0_14, %c0_15] : memref<1x4x16x4xf32, #tpu.memory_space<vmem>>, vector<1x1x16x4xf32>
    %15 = vector.shape_cast %14 : vector<1x1x16x4xf32> to vector<16x4xf32>
    %16 = vector.shape_cast %15 : vector<16x4xf32> to vector<4x4x4xf32>
    %17 = tpu.transpose %16, [0, 2, 1] : vector<4x4x4xf32> -> vector<4x4x4xf32>
    %c0_16 = arith.constant 0 : index
    %c0_17 = arith.constant 0 : index
    %c0_18 = arith.constant 0 : index
    %c8 = arith.constant 8 : index
    %18 = vector.load %arg3[%c0_16, %c0_17, %c0_18, %c8] : memref<1x4x4x16xf32, #tpu.memory_space<vmem>>, vector<1x4x4x4xf32>
    %19 = vector.shape_cast %18 : vector<1x4x4x4xf32> to vector<4x4x4xf32>
    %20 = vector.shape_cast %17 : vector<4x4x4xf32> to vector<1x4x4x4xf32>
    tpu.vector_store %arg3[%c0_16, %c0_17, %c0_18, %c8], %20 {strides = array<i32>} : memref<1x4x4x16xf32, #tpu.memory_space<vmem>>, vector<1x4x4x4xf32>,
    %c0_19 = arith.constant 0 : index
    %c3 = arith.constant 3 : index
    %c0_20 = arith.constant 0 : index
    %c0_21 = arith.constant 0 : index
    %21 = vector.load %arg2[%c0_19, %c3, %c0_20, %c0_21] : memref<1x4x16x4xf32, #tpu.memory_space<vmem>>, vector<1x1x16x4xf32>
    %22 = vector.shape_cast %21 : vector<1x1x16x4xf32> to vector<16x4xf32>
    %23 = vector.shape_cast %22 : vector<16x4xf32> to vector<4x4x4xf32>
    %24 = tpu.transpose %23, [0, 2, 1] : vector<4x4x4xf32> -> vector<4x4x4xf32>
    %c0_22 = arith.constant 0 : index
    %c0_23 = arith.constant 0 : index
    %c0_24 = arith.constant 0 : index
    %c12 = arith.constant 12 : index
    %25 = vector.load %arg3[%c0_22, %c0_23, %c0_24, %c12] : memref<1x4x4x16xf32, #tpu.memory_space<vmem>>, vector<1x4x4x4xf32>
    %26 = vector.shape_cast %25 : vector<1x4x4x4xf32> to vector<4x4x4xf32>
    %27 = vector.shape_cast %24 : vector<4x4x4xf32> to vector<1x4x4x4xf32>
    tpu.vector_store %arg3[%c0_22, %c0_23, %c0_24, %c12], %27 {strides = array<i32>} : memref<1x4x4x16xf32, #tpu.memory_space<vmem>>, vector<1x4x4x4xf32>,
    return
  }
  func.func @transform_0(%arg0: i32, %arg1: i32) -> (i32, i32, i32, i32) {
    %c0_i32 = arith.constant 0 : i32
    %c0_i32_0 = arith.constant 0 : i32
    %c0_i32_1 = arith.constant 0 : i32
    return %arg0, %arg1, %c0_i32, %c0_i32_0 : i32, i32, i32, i32
  }
  func.func @transform_1(%arg0: i32, %arg1: i32) -> (i32, i32, i32, i32) {
    %c0_i32 = arith.constant 0 : i32
    %c0_i32_0 = arith.constant 0 : i32
    %c0_i32_1 = arith.constant 0 : i32
    return %arg0, %arg1, %c0_i32, %c0_i32_0 : i32, i32, i32, i32
  }
}

</mosaic_0001>

<bundles_post_ra>
// kernel: tpu_custom_call.1
= control target key start
LH: loop header
LB: loop body
LE: loop exit
PB: predicated region body
PF: predicated region fallthrough
CT: control target
= control target key end

     0   :  { %6 = vsyncpa [#allocation3], 0  ;;  %s1236_s0 = inlined_call_operand.vmem [shape: f32[2,8,16,4], index: 0, kind: input, shape index: {}]   ;;  %s1237_s1 = inlined_call_operand.hbm [shape: f32[2,8,4,16], index: 1, kind: output, shape index: {}]  }
   0x1   :  { %8 = vsyncpa [#allocation3 + $0x1], 0  ;;  %s1075_s6 = smov 0   ;;  %s1077_s7 = smov 0  }
   0x2   :  { %s1079_s8 = smov 0   ;;  %s1081_s9 = smov 0  }
   0x3   :  { %s1083_s10 = smov 0   ;;  %s1085_s11 = smov 0  }
   0x4   :  { %s1087_s12 = smov 0   ;;  %s1089_s13 = smov 0  }
   0x5 LB: > { %s867_s14 = sadd.s32 4294967295, %s1059_s13   ;;  %s868_s15 = sadd.s32 4294967294, %s1059_s13   ;;  %s1059_s13 = sphi %s1089_s13, %s14_s13   ;;  %s1055_s12 = sphi %s1087_s12, %s1246_s12   ;;  %s1051_s11 = sphi %s1085_s11, %s1245_s11   ;;  %s1047_s10 = sphi %s1083_s10, %s1244_s10   ;;  %s1043_s9 = sphi %s1081_s9, %s1243_s9   ;;  %s1039_s8 = sphi %s1079_s8, %s1242_s8   ;;  %s1035_s7 = sphi %s1077_s7, %s1241_s7   ;;  %s1031_s6 = sphi %s1075_s6, %s1240_s6  }
   0x6   : > { %s23_s16 = sadd.s32 1, %s1051_s11  ;;  %s26_s17 = sadd.s32 1, %s1055_s12 }
   0x7   : > { %p24_p0 = scmp.ge.s32.totalorder %s23_s16, 2  ;;  %p73_p1 = scmp.ne.s32.totalorder %s1039_s8, %s1035_s7 }
   0x8   : > { %p74_p2 = scmp.eq.s32.totalorder %s867_s14, 3  ;;  %p79_p5 = scmp.ne.s32.totalorder %s1035_s7, %s1031_s6 }
   0x9   : > { %s1248_s16 = smov (%p24_p0, %s23_s16), 0  ;;  %s1250_s17 = smov (!%p24_p0, %s26_s17), %s1055_s12 }
   0xa   : > { %s59_s18 = ssub.s32 %s1051_s11, %s1248_s16  ;;  %p1126_p3 = por %p74_p2, %p73_p1 }
   0xb   : > { %p28_p4 = scmp.ge.s32.totalorder %s1250_s17, 2  ;;  %p80_p6 = scmp.eq.s32.totalorder %s868_s15, 3 }
   0xc   : > { %p871_p7 = scmp.ge.s32.totalorder %s1059_s13, 1  ;;  %p112_p9 = scmp.lt.s32.totalorder %s1059_s13, 5 }
   0xd   : > { %s1252_s17 = smov (%p28_p4, %s1250_s17), 0  ;;  %p1135_p8 = por %p80_p6, %p79_p5 }
   0xe   : > { %s58_s21 = ssub.s32 %s1055_s12, %s1252_s17  ;;  %s63_s22 = sadd.s32 1, %s1039_s8 }
   0xf   : > { %s60_s23 = sor.u32 %s59_s18, %s58_s21  ;;  %p113_p10 = pnand %p871_p7, %p112_p9 }
  0x10   : > { %p61_p11 = scmp.eq.s32.totalorder %s60_s23, 0  ;;  %s1147_s25 = sshll.u32 (!%p113_p10), %s1043_s9, 2 }
  0x11   : > { %116 = sbr.rel (%p113_p10) target bundleno = 370 (0x172), region = 24  ;;  %p138_p12 = scmp.lt.s32.totalorder (!%p113_p10), %s1047_s10, 1 }
  0x12   : > { %s1144_s24 = scalar_select %p61_p11, %s1039_s8, %s63_s22  }
  0x13   : > { %p140_p13 = scmp.lt.s32.totalorder (!%p113_p10), %s1147_s25, 7  ;;  %s1061_s9 = smov (!%p113_p10), 4  }
  0x14   : > { %s134_s14 = sand.u32 (!%p113_p10), 1, %s1035_s7   ;;  %s1062_s21 = smov (!%p113_p10), 8  }
  0x15   : > { %s872_s15 = sshll.u32 (!%p113_p10), %s134_s14, 4  ;;  %s1063_s22 = smov (!%p113_p10), 12  }
  0x16   : > { %s139_s26 = scalar_select %p138_p12, %s1047_s10, 1  ;;  %vm285_vm0 = vcmask 27648   ;;  %vm443_vm1 = vcmask 60448   ;;  %vm601_vm2 = vcmask 93248   ;;  %vm759_vm3 = vcmask 126048  }
  0x17   : > { %s141_s27 = scalar_select %p140_p13, %s1147_s25, 7 }
  0x18   : > { %s875_s28 = sshll.u32 %s139_s26, 4  ;;  %s1161_s18 = scalar_lea.vmem [#allocation2], %s872_s15 }
  0x19   : > { %s874_s29 = sshll.u32 %s141_s27, 1  ;;  %s885_s23 = sshll.u32 %s1047_s10, 3 }
  0x1a   : > { %s144_s30 = sadd.s32 %s875_s28, %s874_s29  ;;  %s776_s26 = sadd.s32 %s885_s23, %s1147_s25 }
  0x1b   : > { %s876_s2 = sshll.u32 %s144_s30, 3  ;;  %s886_s27 = sshll.u32 %s776_s26, 2 }
  0x1c   : > { %s146_s5 = scalar_lea.vmem %s1236_s0, %s876_s2  ;;  %s778_s30 = scalar_lea.hbm %s1237_s1, %s886_s27 }
  0x1d   : > { %v149_v0 = vld [vmem:[%s146_s5] sm:$0xff]  ;;  %v150_v1 = vld [vmem:[%s146_s5 + $0x8] sm:$0xff]  ;;  %v877_v2 = vld [vmem:[%s146_s5 + $0x10] sm:$0xff]  ;;  %s779_s2 = sshll.u32 %s1161_s18, 4  ;;  %s781_s3 = sshll.u32 %s778_s30, 4  ;;  %s780_s2 = int_to_ptr.vmem [resolvable:$true] %s779_s2  ;;  %s782_s3 = int_to_ptr.hbm [resolvable:$true] %s781_s3 }
  0x1e   : > { %157 = vxpose.xlu0.b32.start.end [1/1] (short) (narrow) %v149_v0, 8  ;;  %221 = vxpose.xlu1.b32.start.end [1/1] (short) (narrow) %v150_v1, 8  ;;  %v153_v3 = vrot.slane %v149_v0, 4  ;;  %v154_v4 = vrot.slane %v150_v1, 4  ;;  %v295_v5 = vrot.slane %v877_v2, 4  ;;  %v878_v6 = vld [vmem:[%s146_s5 + $0x18] sm:$0xff] }
  0x1f   : > { %299 = vxpose.xlu2.b32.start.end [1/1] (short) (narrow) %v877_v2, 8  ;;  %v296_v7 = vrot.slane %v878_v6, 4  ;;  %v879_v8 = vld [vmem:[%s146_s5 + $0x20] sm:$0xff]  ;;  %v880_v9 = vld [vmem:[%s146_s5 + $0x28] sm:$0xff]  ;;  %v881_v12 = vld [vmem:[%s146_s5 + $0x30] sm:$0xff]  ;;  %s765_s10 = scalar_lea.sflag [#allocation3], %s134_s14 }
  0x20   : > { %v453_v10 = vrot.slane %v879_v8, 4  ;;  %v454_v11 = vrot.slane %v880_v9, 4  ;;  %v611_v13 = vrot.slane %v881_v12, 4  ;;  %v882_v14 = vld [vmem:[%s146_s5 + $0x38] sm:$0xff]  ;;  %s979_s4 = sshra.s32 %s782_s3, 4  ;;  %s980_s4 = int_to_ptr.hbm [resolvable:$true] %s979_s4 }
  0x21   : > { %v612_v15 = vrot.slane %v882_v14, 4  ;;  %s981_s25 = scalar_lea.hbm %s980_s4, 16  ;;  %p986_p4 = scmp.lt.s32.totalorder %s980_s4, %s1237_s1 }
  0x22   : > { %p982_p0 = scmp.ne.s32.totalorder %s980_s4, %s981_s25 }
  0x24   : > { %p983_p1 = pnand %p982_p0, %p1126_p3 }
  0x26   : > { %189 = vxpose.xlu0.b32.start.end [1/1] (short) (narrow) %v153_v3, 8  ;;  %253 = vxpose.xlu1.b32.start.end [1/1] (short) (narrow) %v154_v4, 8  ;;  %p984_p2 = pneg %p983_p1 }
  0x27   : > { %331 = vxpose.xlu2.b32.start.end [1/1] (short) (narrow) %v295_v5, 8 }
  0x2e   : > { %363 = vxpose.xlu0.b32.start.end [1/1] (short) (narrow) %v878_v6, 8  ;;  %395 = vxpose.xlu1.b32.start.end [1/1] (short) (narrow) %v296_v7, 8 }
  0x2f   : > { %457 = vxpose.xlu2.b32.start.end [1/1] (short) (narrow) %v879_v8, 8 }
  0x36   : > { %521 = vxpose.xlu0.b32.start.end [1/1] (short) (narrow) %v880_v9, 8  ;;  %489 = vxpose.xlu1.b32.start.end [1/1] (short) (narrow) %v453_v10, 8 }
  0x37   : > { %553 = vxpose.xlu2.b32.start.end [1/1] (short) (narrow) %v454_v11, 8 }
  0x3e   : > { %679 = vxpose.xlu0.b32.start.end [1/1] (short) (narrow) %v882_v14, 8  ;;  %647 = vxpose.xlu1.b32.start.end [1/1] (short) (narrow) %v611_v13, 8 }
  0x3f   : > { %615 = vxpose.xlu2.b32.start.end [1/1] (short) (narrow) %v881_v12, 8 }
  0x47   : > { %711 = vxpose.xlu2.b32.start.end [1/1] (short) (narrow) %v612_v15, 8 }
  0xb8   : > { %v315_v16 = vpop.trf.xlu2 }
  0xb9   : > { %431 = vrot.lane.b32.xlu2 %v315_v16, %s1061_s9 }
  0xc0   : > { %v347_v17 = vpop.trf.xlu2 }
  0xc1   : > { %433 = vrot.lane.b32.xlu0 %v347_v17, %s1061_s9 }
  0xc2   : > { %v173_v18 = vpop.trf.xlu0  ;;  %v237_v19 = vpop.trf.xlu1 }
  0xc3   : > { %286 = vst.msk [vmem:[%s1161_s18] sm:$0xf] %vm285_vm0, %v173_v18 }
  0xc4   : > { %288 = vst.msk [vmem:[%s1161_s18 + $0x8] sm:$0xf] %vm285_vm0, %v237_v19 }
  0xc8   : > { %v473_v20 = vpop.trf.xlu2 }
  0xc9   : > { %589 = vrot.lane.b32.xlu2 %v473_v20, %s1062_s21 }
  0xca   : > { %v205_v21 = vpop.trf.xlu0  ;;  %v269_v22 = vpop.trf.xlu1 }
  0xcb   : > { %287 = vst.msk [vmem:[%s1161_s18 + $0x4] sm:$0xf] %vm285_vm0, %v205_v21 }
  0xcc   : > { %289 = vst.msk [vmem:[%s1161_s18 + $0xc] sm:$0xf] %vm285_vm0, %v269_v22 }
  0xd0   : > { %v569_v25 = vpop.trf.xlu2 }
  0xd2   : > { %v379_v23 = vpop.trf.xlu0  ;;  %v411_v24 = vpop.trf.xlu1 }
  0xd3   : > { %435 = vrot.lane.b32.xlu1 %v379_v23, %s1061_s9 }
  0xd8   : > { %v631_v28 = vpop.trf.xlu2 }
  0xda   : > { %v505_v26 = vpop.trf.xlu1  ;;  %v537_v27 = vpop.trf.xlu0 }
  0xdb   : > { %437 = vrot.lane.b32.xlu1 %v411_v24, %s1061_s9  ;;  %591 = vrot.lane.b32.xlu0 %v505_v26, %s1062_s21 }
  0xe0   : > { %v727_v31 = vpop.trf.xlu2 }
  0xe2   : > { %v663_v29 = vpop.trf.xlu1  ;;  %v695_v30 = vpop.trf.xlu0 }
  0xe3   : > { %593 = vrot.lane.b32.xlu1 %v537_v27, %s1062_s21  ;;  %747 = vrot.lane.b32.xlu0 %v631_v28, %s1063_s22 }
  0xe4   : > { %749 = vrot.lane.b32.xlu2 %v663_v29, %s1063_s22 }
  0xeb   : > { %595 = vrot.lane.b32.xlu1 %v569_v25, %s1062_s21  ;;  %s985_s21 = scalar_lea.hbm %s1237_s1, 64 }
  0xec   : > { %p987_p5 = scmp.lt.s32.totalorder %s985_s21, %s981_s25 }
  0xee   : > { %p988_p6 = por %p987_p5, %p986_p4 }
  0xf0   : > { %p989_p7 = pnand %p988_p6, %p984_p2 }
  0xf3   : > { %751 = vrot.lane.b32.xlu1 %v695_v30, %s1063_s22 }
  0xfb   : > { %753 = vrot.lane.b32.xlu1 %v727_v31, %s1063_s22 }
 0x113   : > { %v432_v32 = vpop.permute.xlu2 %431 }
 0x114   : > { %444 = vst.msk [vmem:[%s1161_s18] sm:$0xf] %vm443_vm1, %v432_v32 }
 0x123   : > { %v590_v33 = vpop.permute.xlu2 %589 }
 0x124   : > { %602 = vst.msk [vmem:[%s1161_s18] sm:$0xf] %vm601_vm2, %v590_v33 }
 0x133   : > { %v434_v34 = vpop.permute.xlu0 %433 }
 0x134   : > { %445 = vst.msk [vmem:[%s1161_s18 + $0x4] sm:$0xf] %vm443_vm1, %v434_v34 }
 0x13e   : > { %v750_v36 = vpop.permute.xlu2 %749 }
 0x145   : > { %v436_v35 = vpop.permute.xlu1 %435 }
 0x146   : > { %446 = vst.msk [vmem:[%s1161_s18 + $0x8] sm:$0xf] %vm443_vm1, %v436_v35 }
 0x14d   : > { %v438_v37 = vpop.permute.xlu1 %437  ;;  %v592_v38 = vpop.permute.xlu0 %591 }
 0x14e   : > { %447 = vst.msk [vmem:[%s1161_s18 + $0xc] sm:$0xf] %vm443_vm1, %v438_v37 }
 0x14f   : > { %603 = vst.msk [vmem:[%s1161_s18 + $0x4] sm:$0xf] %vm601_vm2, %v592_v38 }
 0x150   : > { %761 = vst.msk [vmem:[%s1161_s18 + $0x4] sm:$0xf] %vm759_vm3, %v750_v36 }
 0x155   : > { %v594_v39 = vpop.permute.xlu1 %593  ;;  %v748_v40 = vpop.permute.xlu0 %747 }
 0x156   : > { %604 = vst.msk [vmem:[%s1161_s18 + $0x8] sm:$0xf] %vm601_vm2, %v594_v39 }
 0x157   : > { %760 = vst.msk [vmem:[%s1161_s18] sm:$0xf] %vm759_vm3, %v748_v40 }
 0x15d   : > { %v596_v41 = vpop.permute.xlu1 %595 }
 0x15e   : > { %605 = vst.msk [vmem:[%s1161_s18 + $0xc] sm:$0xf] %vm601_vm2, %v596_v41 }
 0x165   : > { %v752_v42 = vpop.permute.xlu1 %751 }
 0x166   : > { %762 = vst.msk [vmem:[%s1161_s18 + $0x8] sm:$0xf] %vm759_vm3, %v752_v42 }
 0x16d   : > { %v754_v43 = vpop.permute.xlu1 %753 }
 0x16e   : > { %763 = vst.msk [vmem:[%s1161_s18 + $0xc] sm:$0xf] %vm759_vm3, %v754_v43 }
 0x16f   : > { %992 = shalt.err (!%p989_p7)
}
 0x170   : > { %s1064_s14 = smov 64  }
 0x171   : > { %889 = dma.vmem_to_hbm [thread:$0]  (%p1126_p3), %s780_s2, 256, %s782_s3, %s765_s10, %s1064_s14, %s1064_s14, %s1061_s9  }
 0x172 PF: > { %p895_p9 = scmp.ge.s32.totalorder %s1059_s13, 2  ;;  %s796_s18 = sand.u32 1, %s1031_s6  }
 0x173   : > { %s797_s26 = scalar_lea.sflag [#allocation3], %s796_s18 }
 0x174   : > { %p892_p10 = pnand %p895_p9, %p1135_p8 }
 0x176   : > { %p893_p11 = pneg %p892_p10 }
 0x178   : > { %1026 = dma.done.wait (%p893_p11), %s797_s26, 256  }
 0x179   : > { %1028 = vsyncadd (%p893_p11), %s797_s26, 4294967040  ;;  %s14_s13 = sadd.s32 1, %s1059_s13   ;;  %s1240_s6 = smov %s1035_s7 }
 0x17a   : > { %p11_p12 = scmp.ge.s32.totalorder %s14_s13, 6   ;;  %s1241_s7 = smov %s1039_s8 }
 0x17b   : > { %s1242_s8 = smov %s1144_s24  ;;  %s1243_s9 = smov %s1051_s11 }
 0x17c   : > { %s1244_s10 = smov %s1055_s12  ;;  %s1245_s11 = smov %s1248_s16 }
 0x17d   : > { %s1246_s12 = smov %s1252_s17  ;;  %13 = sbr.rel (!%p11_p12) target bundleno = 5 (0x5), region = 62 }
 0x182   :  { %803 = vsyncpa [#allocation3], 1 }
 0x183   :  { %805 = vsyncpa [#allocation3 + $0x1], 1 }

</bundles_post_ra>
